<compile_context>
chip_gen: v7x
topology: tpu7x:2x2x1
jax: 0.10.0
libtpu: 0.0.40
codegen_flags: <defaults>
</compile_context>

<pallas_src>
import jax
import jax.numpy as jnp
from jax import lax
from jax.experimental import pallas as pl
from jax.experimental.pallas import tpu as pltpu


def _round_up(x, m):
    return ((x + m - 1) // m) * m


def _cdiv(a, b):
    return -(-a // b)


def _choose_batch_tile(B, block_b):
    """Pick the batch tile TB.

    The output is lane-major (O, B_pad) with block (O, TB), so whenever there
    is more than one grid step TB must be a multiple of 128 (lane dim of the
    output block).  Aim for >= 2 steps so both v7x TensorCores get work; use a
    single full-array tile for tiny batches.
    """
    B16 = _round_up(B, 16)            # bf16 sublane-packing granularity
    if B16 <= 128:
        return B16                    # single tile == full array -> always legal
    block_b = max(128, _round_up(block_b, 128))
    n_tiles = max(2, _cdiv(B16, block_b))
    return _round_up(_cdiv(B16, n_tiles), 128)


def positive_mlp_kernel(x_ref, w1_ref, b1_ref, w2_ref, b2_ref, w3_ref, b3_ref,
                        o_ref):
    # In-kernel cast of the f32 batch tile to the weight dtype (no wrapper-side
    # HBM round-trip for the cast).
    x = x_ref[...].astype(w1_ref.dtype)                     # (TB, D_in) bf16

    # Layer 1: Linear + ReLU.  bf16 MXU matmul, f32 accumulation + epilogue.
    h1 = jnp.dot(x, w1_ref[...], preferred_element_type=jnp.float32)
    h1 = jnp.maximum(h1 + b1_ref[...], 0.0)                 # (TB, H) f32

    # Layer 2: Linear + ReLU.
    h2 = jnp.dot(h1.astype(w2_ref.dtype), w2_ref[...],
                 preferred_element_type=jnp.float32)
    h2 = jnp.maximum(h2 + b2_ref[...], 0.0)                 # (TB, H) f32

    # Layer 3, lane-major: w3 is stored (O, H); contract both operands on H so
    # the result is (O, TB) with the batch in the lane dimension -> the store
    # is a dense, un-padded row per tile.
    h3 = lax.dot_general(w3_ref[...], h2.astype(w3_ref.dtype),
                         dimension_numbers=(((1,), (1,)), ((), ())),
                         preferred_element_type=jnp.float32)  # (O, TB)
    o_ref[...] = jnp.abs(h3 + b3_ref[...]).astype(o_ref.dtype)


def positive_mlp(x, params, *, block_b=512):
    """x: (B, input_dim) float32 (or bf16).

    params: w1 (D_in,H) bf16, b1 (1,H) f32, w2 (H,H) bf16, b2 (1,H) f32,
            w3 (O,H) bf16 (PyTorch out-by-in layout), b3 (O,1) f32.
    Returns abs(MLP(x)) with shape (B, O) in float32.
    """
    B, D_in = x.shape
    H = params["w1"].shape[1]
    O = params["w3"].shape[0]
    w_itemsize = jnp.dtype(params["w1"].dtype).itemsize
    x_itemsize = jnp.dtype(x.dtype).itemsize

    # Batch tiling (multiple of 128 when multi-tile; >= 2 steps for v7x's 2 TCs).
    TB = _choose_batch_tile(B, block_b)
    B_pad = _round_up(B, TB)
    if B_pad != B:
        x = jnp.pad(x, ((0, B_pad - B), (0, 0)))
    nb = B_pad // TB

    # VMEM budget: resident weights + double-buffered x/out tiles + activation
    # headroom, capped at ~2/3 of this device's physical VMEM.
    weight_bytes = (D_in * H + H * H + O * H) * w_itemsize + (2 * H + O) * 4
    act_bytes = (2 * TB * D_in * x_itemsize      # double-buffered x tiles
                 + 2 * O * TB * 4                # double-buffered out tiles
                 + 4 * TB * H * 4)               # intermediate activations
    try:
        vmem_cap = int(pltpu.get_tpu_info().vmem_capacity_bytes)
    except Exception:
        vmem_cap = 64 << 20                      # v7x-safe fallback
    vmem_limit = int(min(max(2 * (weight_bytes + act_bytes), 16 << 20),
                         (2 * vmem_cap) // 3))

    cost = pl.CostEstimate(
        flops=2 * B_pad * (D_in * H + H * H + H * O),
        transcendentals=0,
        bytes_accessed=(B_pad * D_in * x_itemsize + O * B_pad * 4
                        + weight_bytes),
    )

    def const(shape):
        # Constant index_map -> operand is DMA'd once and stays VMEM-resident.
        return pl.BlockSpec(shape, lambda i: tuple(0 for _ in shape))

    out_lane = pl.pallas_call(
        positive_mlp_kernel,
        out_shape=jax.ShapeDtypeStruct((O, B_pad), jnp.float32),
        grid=(nb,),
        in_specs=[
            pl.BlockSpec((TB, D_in), lambda i: (i, 0)),   # batch-tiled input
            const((D_in, H)),                             # w1 (VMEM-resident)
            const((1, H)),                                # b1
            const((H, H)),                                # w2
            const((1, H)),                                # b2
            const((O, H)),                                # w3 (out-by-in layout)
            const((O, 1)),                                # b3
        ],
        out_specs=pl.BlockSpec((O, TB), lambda i: (0, i)),  # lane-major output
        compiler_params=pltpu.CompilerParams(
            dimension_semantics=("parallel",),
            vmem_limit_bytes=vmem_limit,
        ),
        cost_estimate=cost,
    )(x, params["w1"], params["b1"], params["w2"], params["b2"],
      params["w3"], params["b3"])

    # (O, B_pad) -> (B, O); tiny wrapper-side transpose/slice.
    return out_lane[:, :B].T


def init_params(key, input_dim, hidden, out_size=1, w_dtype=jnp.bfloat16):
    """PyTorch-Linear-style init (uniform +/- 1/sqrt(fan_in)).

    w1/w2 stored (in, out); w3 stored (out, in) for the lane-major layer-3
    contraction; biases kept f32 (b3 as a column so it broadcasts over lanes).
    """
    ks = jax.random.split(key, 6)

    def uniform(k, shape, fan_in):
        bound = float(fan_in) ** -0.5
        return jax.random.uniform(k, shape, jnp.float32, -bound, bound)

    w1 = uniform(ks[0], (input_dim, hidden), input_dim).astype(w_dtype)
    b1 = uniform(ks[1], (1, hidden), input_dim)
    w2 = uniform(ks[2], (hidden, hidden), hidden).astype(w_dtype)
    b2 = uniform(ks[3], (1, hidden), hidden)
    w3 = uniform(ks[4], (out_size, hidden), hidden).astype(w_dtype)
    b3 = uniform(ks[5], (out_size, 1), hidden)
    return {"w1": w1, "b1": b1, "w2": w2, "b2": b2, "w3": w3, "b3": b3}


def positive_mlp_ref(x, p):
    """Pure-JAX reference mirroring the kernel numerics (bf16 matmul operands,
    f32 accumulation + f32 bias/ReLU/abs epilogue)."""
    w_dtype = p["w1"].dtype
    h = x.astype(w_dtype)
    h1 = jnp.dot(h, p["w1"], preferred_element_type=jnp.float32) + p["b1"]
    h1 = jnp.maximum(h1, 0.0).astype(w_dtype)
    h2 = jnp.dot(h1, p["w2"], preferred_element_type=jnp.float32) + p["b2"]
    h2 = jnp.maximum(h2, 0.0).astype(w_dtype)
    h3 = jnp.dot(h2, p["w3"].T, preferred_element_type=jnp.float32) + p["b3"].T
    return jnp.abs(h3)


if __name__ == "__main__":
    key = jax.random.PRNGKey(0)
    k_x, k_p = jax.random.split(key)

    # Small, lane/MXU-aligned dims; out_size=1 matches the module default.
    # batch=256 gives a 2-step grid (both v7x TensorCores) with no batch pad.
    batch, input_dim, hidden, out_size = 256, 128, 128, 1
    x = jax.random.normal(k_x, (batch, input_dim), jnp.float32)
    params = init_params(k_p, input_dim, hidden, out_size)

    out = jax.block_until_ready(positive_mlp(x, params))
    ref = positive_mlp_ref(x, params)

    assert out.shape == (batch, out_size)
    assert bool(jnp.all(out >= 0.0))
    assert jnp.allclose(out, ref, atol=1e-3, rtol=1e-3), \
        float(jnp.max(jnp.abs(out - ref)))

    print("KERNEL_OK")
</pallas_src>

<mosaic_0001>
module attributes {stable_mosaic.version = 11 : i64} {
  func.func @positive_mlp_kernel(%arg0: i32, %arg1: memref<128x128xf32, #tpu.memory_space<vmem>>, %arg2: memref<128x128xbf16, #tpu.memory_space<vmem>>, %arg3: memref<1x128xf32, #tpu.memory_space<vmem>>, %arg4: memref<128x128xbf16, #tpu.memory_space<vmem>>, %arg5: memref<1x128xf32, #tpu.memory_space<vmem>>, %arg6: memref<1x128xbf16, #tpu.memory_space<vmem>>, %arg7: memref<1x1xf32, #tpu.memory_space<vmem>>, %arg8: memref<1x128xf32, #tpu.memory_space<vmem>>) attributes {dimension_semantics = [#tpu.dimension_semantics<parallel>], iteration_bounds = array<i64: 2>, scalar_prefetch = 0 : i64, scratch_operands = 0 : i64, tpu.core_type = #tpu.core_type<tc>, window_params = [{transform_indices = @transform_0, window_bounds = array<i64: 128, 128>}, {pipeline_mode = #tpu.pipeline_mode<synchronous>, transform_indices = @transform_1, window_bounds = array<i64: 128, 128>}, {pipeline_mode = #tpu.pipeline_mode<synchronous>, transform_indices = @transform_2, window_bounds = array<i64: 1, 128>}, {pipeline_mode = #tpu.pipeline_mode<synchronous>, transform_indices = @transform_3, window_bounds = array<i64: 128, 128>}, {pipeline_mode = #tpu.pipeline_mode<synchronous>, transform_indices = @transform_4, window_bounds = array<i64: 1, 128>}, {pipeline_mode = #tpu.pipeline_mode<synchronous>, transform_indices = @transform_5, window_bounds = array<i64: 1, 128>}, {pipeline_mode = #tpu.pipeline_mode<synchronous>, transform_indices = @transform_6, window_bounds = array<i64: 1, 1>}, {transform_indices = @transform_7, window_bounds = array<i64: 1, 128>}]} {
    %c0 = arith.constant 0 : index
    %c0_0 = arith.constant 0 : index
    %0 = vector.load %arg1[%c0, %c0_0] : memref<128x128xf32, #tpu.memory_space<vmem>>, vector<128x128xf32>
    %1 = arith.truncf %0 : vector<128x128xf32> to vector<128x128xbf16>
    %c0_1 = arith.constant 0 : index
    %c0_2 = arith.constant 0 : index
    %2 = vector.load %arg2[%c0_1, %c0_2] : memref<128x128xbf16, #tpu.memory_space<vmem>>, vector<128x128xbf16>
    %cst = arith.constant dense<0.000000e+00> : vector<128x128xf32>
    %3 = tpu.matmul %1, %2, %cst {dimension_numbers = #tpu.dot_dimension_numbers<[1], [0], [0], [1], [0, 0, 1, 1], [], []>} : vector<128x128xbf16>, vector<128x128xbf16>, vector<128x128xf32> -> vector<128x128xf32>
    %c0_3 = arith.constant 0 : index
    %c0_4 = arith.constant 0 : index
    %4 = vector.load %arg3[%c0_3, %c0_4] : memref<1x128xf32, #tpu.memory_space<vmem>>, vector<1x128xf32>
    %5 = vector.broadcast %4 : vector<1x128xf32> to vector<128x128xf32>
    %6 = arith.addf %3, %5 : vector<128x128xf32>
    %cst_5 = arith.constant 0.000000e+00 : f32
    %7 = vector.broadcast %cst_5 : f32 to vector<128x128xf32>
    %8 = arith.maximumf %6, %7 : vector<128x128xf32>
    %9 = arith.truncf %8 : vector<128x128xf32> to vector<128x128xbf16>
    %c0_6 = arith.constant 0 : index
    %c0_7 = arith.constant 0 : index
    %10 = vector.load %arg4[%c0_6, %c0_7] : memref<128x128xbf16, #tpu.memory_space<vmem>>, vector<128x128xbf16>
    %cst_8 = arith.constant dense<0.000000e+00> : vector<128x128xf32>
    %11 = tpu.matmul %9, %10, %cst_8 {dimension_numbers = #tpu.dot_dimension_numbers<[1], [0], [0], [1], [0, 0, 1, 1], [], []>} : vector<128x128xbf16>, vector<128x128xbf16>, vector<128x128xf32> -> vector<128x128xf32>
    %c0_9 = arith.constant 0 : index
    %c0_10 = arith.constant 0 : index
    %12 = vector.load %arg5[%c0_9, %c0_10] : memref<1x128xf32, #tpu.memory_space<vmem>>, vector<1x128xf32>
    %13 = vector.broadcast %12 : vector<1x128xf32> to vector<128x128xf32>
    %14 = arith.addf %11, %13 : vector<128x128xf32>
    %cst_11 = arith.constant 0.000000e+00 : f32
    %15 = vector.broadcast %cst_11 : f32 to vector<128x128xf32>
    %16 = arith.maximumf %14, %15 : vector<128x128xf32>
    %c0_12 = arith.constant 0 : index
    %c0_13 = arith.constant 0 : index
    %17 = vector.load %arg6[%c0_12, %c0_13] : memref<1x128xbf16, #tpu.memory_space<vmem>>, vector<1x128xbf16>
    %18 = arith.truncf %16 : vector<128x128xf32> to vector<128x128xbf16>
    %cst_14 = arith.constant dense<0.000000e+00> : vector<1x128xf32>
    %19 = tpu.matmul %17, %18, %cst_14 {dimension_numbers = #tpu.dot_dimension_numbers<[1], [1], [0], [0], [0, 0, 1, 0], [], []>} : vector<1x128xbf16>, vector<128x128xbf16>, vector<1x128xf32> -> vector<1x128xf32>
    %c0_15 = arith.constant 0 : index
    %c0_16 = arith.constant 0 : index
    %20 = vector.load %arg7[%c0_15, %c0_16] : memref<1x1xf32, #tpu.memory_space<vmem>>, vector<1x1xf32>
    %21 = vector.broadcast %20 : vector<1x1xf32> to vector<1x128xf32>
    %22 = arith.addf %19, %21 : vector<1x128xf32>
    %23 = math.absf %22 : vector<1x128xf32>
    %c0_17 = arith.constant 0 : index
    %c0_18 = arith.constant 0 : index
    %24 = vector.load %arg8[%c0_17, %c0_18] : memref<1x128xf32, #tpu.memory_space<vmem>>, vector<1x128xf32>
    tpu.vector_store %arg8[%c0_17, %c0_18], %23 {strides = array<i32>} : memref<1x128xf32, #tpu.memory_space<vmem>>, vector<1x128xf32>,
    return
  }
  func.func @transform_0(%arg0: i32) -> (i32, i32) {
    %c0_i32 = arith.constant 0 : i32
    %c0_i32_0 = arith.constant 0 : i32
    return %arg0, %c0_i32 : i32, i32
  }
  func.func @transform_1(%arg0: i32) -> (i32, i32) {
    %c0_i32 = arith.constant 0 : i32
    %c0_i32_0 = arith.constant 0 : i32
    %c0_i32_1 = arith.constant 0 : i32
    return %c0_i32, %c0_i32_0 : i32, i32
  }
  func.func @transform_2(%arg0: i32) -> (i32, i32) {
    %c0_i32 = arith.constant 0 : i32
    %c0_i32_0 = arith.constant 0 : i32
    %c0_i32_1 = arith.constant 0 : i32
    return %c0_i32, %c0_i32_0 : i32, i32
  }
  func.func @transform_3(%arg0: i32) -> (i32, i32) {
    %c0_i32 = arith.constant 0 : i32
    %c0_i32_0 = arith.constant 0 : i32
    %c0_i32_1 = arith.constant 0 : i32
    return %c0_i32, %c0_i32_0 : i32, i32
  }
  func.func @transform_4(%arg0: i32) -> (i32, i32) {
    %c0_i32 = arith.constant 0 : i32
    %c0_i32_0 = arith.constant 0 : i32
    %c0_i32_1 = arith.constant 0 : i32
    return %c0_i32, %c0_i32_0 : i32, i32
  }
  func.func @transform_5(%arg0: i32) -> (i32, i32) {
    %c0_i32 = arith.constant 0 : i32
    %c0_i32_0 = arith.constant 0 : i32
    %c0_i32_1 = arith.constant 0 : i32
    return %c0_i32, %c0_i32_0 : i32, i32
  }
  func.func @transform_6(%arg0: i32) -> (i32, i32) {
    %c0_i32 = arith.constant 0 : i32
    %c0_i32_0 = arith.constant 0 : i32
    %c0_i32_1 = arith.constant 0 : i32
    return %c0_i32, %c0_i32_0 : i32, i32
  }
  func.func @transform_7(%arg0: i32) -> (i32, i32) {
    %c0_i32 = arith.constant 0 : i32
    %c0_i32_0 = arith.constant 0 : i32
    return %c0_i32, %arg0 : i32, i32
  }
}

</mosaic_0001>

<bundles_post_ra>
// kernel: tpu_custom_call.1
= control target key start
LH: loop header
LB: loop body
LE: loop exit
PB: predicated region body
PF: predicated region fallthrough
CT: control target
= control target key end

     0   :  { %s1619_s0 = inlined_call_operand.hbm [shape: f32[256,128], index: 0, kind: input, shape index: {}]   ;;  %s1620_s1 = inlined_call_operand.hbm [shape: bf16[128,128], index: 1, kind: input, shape index: {}]   ;;  %s1621_s2 = inlined_call_operand.vmem [shape: f32[1,128], index: 2, kind: input, shape index: {}]   ;;  %s1622_s3 = inlined_call_operand.hbm [shape: bf16[128,128], index: 3, kind: input, shape index: {}]   ;;  %s1623_s4 = inlined_call_operand.vmem [shape: f32[1,128], index: 4, kind: input, shape index: {}]   ;;  %s1624_s5 = inlined_call_operand.vmem [shape: bf16[1,128], index: 5, kind: input, shape index: {}]   ;;  %s1625_s6 = inlined_call_operand.<no memory space> [shape: f32[1,1], index: 6, kind: input, shape index: {}]   ;;  %s1626_s7 = inlined_call_operand.hbm [shape: f32[1,256], index: 7, kind: output, shape index: {}]  }
   0x1   :  { %v12_v0 = vstv %s1625_s6 }
   0x2   :  { %13 = vst [vmem:[#allocation2] sm:$0x1] %v12_v0 }
   0x3   :  { %14 = vsyncpa [#allocation4], 0 }
   0x4   :  { %16 = vsyncpa [#allocation4 + $0x1], 0 }
   0x5   :  { %17 = vsyncpa [#allocation7], 0 }
   0x6   :  { %18 = vsyncpa [#allocation5], 0 }
   0x7   :  { %20 = vsyncpa [#allocation5 + $0x1], 0  ;;  %s1350_s26 = smov 0   ;;  %s1352_s27 = smov 0  }
   0x8   :  { %s1354_s28 = smov 0   ;;  %s1356_s29 = smov 0  }
   0x9 LB: > { %s1371_s6 = sadd.s32 4294967295, %s1294_s29   ;;  %s888_s30 = sadd.s32 4294967294, %s1294_s29   ;;  %s1294_s29 = sphi %s1356_s29, %s1646_s29   ;;  %s1290_s28 = sphi %s1354_s28, %s1645_s28   ;;  %s1286_s27 = sphi %s1352_s27, %s1644_s27   ;;  %s1282_s26 = sphi %s1350_s26, %s1643_s26  }
   0xa   : > { %p46_p0 = scmp.ne.s32.totalorder %s1286_s27, %s1282_s26  ;;  %p1627_p1 = scmp.eq.s32.totalorder %s1371_s6, 0 }
   0xb   : > { %p202_p3 = scmp.eq.s32.totalorder %s888_s30, 1  ;;  %p889_p5 = scmp.ge.s32.totalorder %s1294_s29, 1 }
   0xc   : > { %p1380_p4 = por %p1627_p1, %p46_p0  ;;  %p209_p7 = scmp.lt.s32.totalorder %s1294_s29, 3 }
   0xd   : > { %p1385_p6 = por %p202_p3, %p46_p0  ;;  %s1296_s11 = smov [#allocation6]  }
   0xe   : > { %s1630_s8 = scalar_select %p1380_p4, 1, 0 }
   0xf   : > { %s1631_s9 = scalar_select %p1385_p6, 1, 0 }
  0x10   : > { %p1390_p8 = pnand %p889_p5, %p209_p7  ;;  %s221_s12 = sshll.u32 %s1296_s11, 4  ;;  %s1394_s12 = int_to_ptr.vmem [resolvable:$true] %s221_s12 }
  0x11   : > { %s1297_s14 = smov [#allocation8]   ;;  %s1138_s18 = scalar_lea.hbm %s1620_s1, 1024 }
  0x12   : > { %p1059_p9 = pneg %p1390_p8  ;;  %s237_s15 = sshll.u32 %s1297_s14, 4  ;;  %s1405_s15 = int_to_ptr.vmem [resolvable:$true] %s237_s15 }
  0x13   : > { %p1139_p12 = scmp.ne.s32.totalorder %s1620_s1, %s1138_s18  ;;  %p1145_p5 = scmp.lt.u32.totalorder %s1138_s18, %s1620_s1 }
  0x14   : > { %p1401_p11 = pnand %p1059_p9, %p1627_p1 }
  0x16   : > { %p1140_p13 = pneg %p1401_p11 }
  0x18   : > { %p1141_p0 = pnand %p1140_p13, %p1139_p12 }
  0x1a   : > { %p1142_p3 = pneg %p1141_p0 }
  0x1c   : > { %p1147_p7 = pnand %p1145_p5, %p1142_p3 }
  0x1e   : > { %1150 = shalt.err (!%p1147_p7)
}
  0x1f   : > { %s1151_s23 = scalar_lea.vmem %s1394_s12, 1024  ;;  %p1159_p2 = scmp.lt.s32.totalorder %s1394_s12, %s1394_s12 }
  0x20   : > { %p1152_p9 = scmp.ne.s32.totalorder %s1394_s12, %s1151_s23  ;;  %p1160_p12 = scmp.lt.s32.totalorder %s1151_s23, %s1151_s23 }
  0x22   : > { %p1154_p10 = pnand %p1152_p9, %p1140_p13  ;;  %p1161_p0 = por %p1160_p12, %p1159_p2 }
  0x24   : > { %p1155_p1 = pneg %p1154_p10 }
  0x26   : > { %p1162_p6 = pnand %p1161_p0, %p1155_p1 }
  0x28   : > { %1165 = shalt.err (!%p1162_p6)
}
  0x29   : > { %s1298_s24 = smov 64   ;;  %s1299_s25 = smov 4  }
  0x2a   : > { %1062 = dma.hbm_to_vmem [thread:$0]  (!%p1401_p11), %s1620_s1, 1024, %s1394_s12, [#allocation7], %s1298_s24, %s1298_s24, %s1299_s25  }
  0x2b   : > { %s1166_s17 = scalar_lea.hbm %s1622_s3, 1024 }
  0x2c   : > { %p1167_p2 = scmp.ne.s32.totalorder %s1622_s3, %s1166_s17  ;;  %p1173_p10 = scmp.lt.u32.totalorder %s1166_s17, %s1622_s3 }
  0x2e   : > { %p1169_p1 = pnand %p1167_p2, %p1140_p13 }
  0x30   : > { %p1170_p6 = pneg %p1169_p1 }
  0x32   : > { %p1175_p3 = pnand %p1173_p10, %p1170_p6 }
  0x34   : > { %1178 = shalt.err (!%p1175_p3)
}
  0x35   : > { %s1179_s12 = scalar_lea.vmem %s1405_s15, 1024  ;;  %p1187_p12 = scmp.lt.s32.totalorder %s1405_s15, %s1405_s15 }
  0x36   : > { %p1180_p5 = scmp.ne.s32.totalorder %s1405_s15, %s1179_s12  ;;  %p1188_p0 = scmp.lt.s32.totalorder %s1179_s12, %s1179_s12 }
  0x38   : > { %p1182_p7 = pnand %p1180_p5, %p1140_p13  ;;  %p1189_p2 = por %p1188_p0, %p1187_p12 }
  0x3a   : > { %p1183_p9 = pneg %p1182_p7 }
  0x3c   : > { %p1190_p1 = pnand %p1189_p2, %p1183_p9 }
  0x3e   : > { %1193 = shalt.err (!%p1190_p1)
}
  0x3f   : > { %1065 = dma.hbm_to_vmem [thread:$0]  (!%p1401_p11), %s1622_s3, 1024, %s1405_s15, [#allocation7], %s1298_s24, %s1298_s24, %s1299_s25  }
  0x40   : > { %s1460_s30 = sadd.s32 1, %s1294_s29   ;;  %s33_s13 = sadd.s32 1, %s1290_s28 }
  0x41   : > { %s30_s11 = ssub.s32 %s1294_s29, %s1460_s30  ;;  %p40_p13 = scmp.ne.s32.totalorder %s1290_s28, %s1286_s27 }
  0x42   : > { %p31_p6 = scmp.eq.s32.totalorder %s30_s11, 0  ;;  %p41_p10 = scmp.eq.s32.totalorder %s1294_s29, 0 }
  0x43   : > { %p1634_p3 = scmp.eq.s32.totalorder %s1371_s6, 1  ;;  %p1076_p7 = scmp.lt.s32.totalorder %s1294_s29, 2 }
  0x44   : > { %s1476_s16 = scalar_select %p31_p6, %s1290_s28, %s33_s13  }
  0x45   : > { %p1470_p5 = por %p1634_p3, %p40_p13  ;;  %p42_p9 = por %p41_p10, %p40_p13 }
  0x46   : > { %s260_s17 = sand.u32 1, %s1290_s28   ;;  %s921_s15 = sshll.u32 %s1294_s29, 11 }
  0x47   : > { %s1635_s14 = scalar_select %p1470_p5, 1, 0 }
  0x48   : > { %s893_s18 = sshll.u32 %s260_s17, 7  ;;  %s1483_s19 = scalar_lea.hbm %s1619_s0, %s921_s15 }
  0x49   : > { %s264_s20 = scalar_lea.vmem [#allocation3], %s893_s18  ;;  %p1487_p11 = pnand %p1076_p7, %p42_p9 }
  0x4a   : > { %s271_s21 = sshll.u32 %s264_s20, 4  ;;  %s1491_s22 = scalar_lea.sflag [#allocation4], %s260_s17  ;;  %s1485_s21 = int_to_ptr.vmem [resolvable:$true] %s271_s21 }
  0x4b   : > { %s1194_s23 = scalar_lea.hbm %s1483_s19, 2048  ;;  %p1196_p0 = pneg %p1487_p11 }
  0x4c   : > { %p1195_p12 = scmp.ne.s32.totalorder %s1483_s19, %s1194_s23  ;;  %s1199_s18 = scalar_lea.hbm %s1619_s0, 4096 }
  0x4d   : > { %p1200_p13 = scmp.lt.u32.totalorder %s1483_s19, %s1619_s0  ;;  %p1201_p6 = scmp.lt.u32.totalorder %s1199_s18, %s1194_s23 }
  0x4e   : > { %p1197_p2 = pnand %p1196_p0, %p1195_p12  ;;  %p1203_p3 = scmp.lt.u32.totalorder %s1194_s23, %s1483_s19 }
  0x4f   : > { %p1202_p10 = por %p1201_p6, %p1200_p13 }
  0x50   : > { %p1198_p1 = pneg %p1197_p2 }
  0x51   : > { %p1204_p7 = por %p1203_p3, %p1202_p10 }
  0x53   : > { %p1205_p9 = pnand %p1204_p7, %p1198_p1 }
  0x55   : > { %1208 = shalt.err (!%p1205_p9)
}
  0x56   : > { %s1209_s17 = scalar_lea.vmem %s1485_s21, 2048  ;;  %s1300_s25 = smov [#allocation3]  }
  0x57   : > { %p1210_p12 = scmp.ne.s32.totalorder %s1485_s21, %s1209_s17  ;;  %s1214_s20 = sshll.u32 %s1300_s25, 4  ;;  %s1215_s20 = int_to_ptr.vmem [resolvable:$false] %s1214_s20 }
  0x58   : > { %s1216_s13 = scalar_lea.vmem %s1215_s20, 4096  ;;  %p1217_p4 = scmp.lt.s32.totalorder %s1485_s21, %s1215_s20 }
  0x59   : > { %p1212_p2 = pnand %p1210_p12, %p1196_p0  ;;  %p1218_p13 = scmp.lt.s32.totalorder %s1216_s13, %s1209_s17 }
  0x5b   : > { %p1213_p5 = pneg %p1212_p2  ;;  %p1219_p6 = por %p1218_p13, %p1217_p4 }
  0x5d   : > { %p1220_p10 = pnand %p1219_p6, %p1213_p5 }
  0x5f   : > { %1223 = shalt.err (!%p1220_p10)
}
  0x60   : > { %s1301_s23 = smov 128   ;;  %s1302_s11 = smov 8  }
  0x61   : > { %1069 = dma.hbm_to_vmem [thread:$0]  (!%p1487_p11), %s1483_s19, 2048, %s1485_s21, %s1491_s22, %s1301_s23, %s1301_s23, %s1302_s11  }
  0x62   : > { %283 = sbr.rel (%p1390_p8) target bundleno = 878 (0x36e), region = 48  ;;  %s1522_s18 = sand.u32 (!%p1390_p8), 1, %s1286_s27  }
  0x63   : > { %s897_s15 = sshll.u32 (!%p1390_p8), %s1522_s18, 7  ;;  %s286_s24 = scalar_lea.sflag (!%p1390_p8), [#allocation4], %s1522_s18 }
  0x64   : > { %s1526_s17 = scalar_lea.vmem (!%p1390_p8), [#allocation3], %s897_s15  ;;  %p1637_p4 = scmp.ne.s32.totalorder (!%p1390_p8), %s1630_s8, 0 }
  0x69   : > { %1269 = dma.done.wait (%p1637_p4), %s286_s24, 2048  }
  0x6a   : > { %1271 = vsyncadd (%p1637_p4), %s286_s24, 4294965248  ;;  %p1638_p5 = scmp.eq.s32.totalorder %s1371_s6, 0 }
  0x6c   : > { %1273 = dma.done.wait (%p1638_p5), [#allocation7], 2048   ;;  %p1639_p8 = pmov %p1638_p5 }
  0x6d   : > { %v1122_v1 = vld [vmem:[#allocation6] sm:$0xff]   ;;  %v1123_v2 = vld [vmem:[#allocation6 + $0x8] sm:$0xff]   ;;  %v1124_v3 = vld [vmem:[#allocation6 + $0x10] sm:$0xff]   ;;  %vm1304_vm0 = vmmov 0   ;;  %s918_s25 = sshll.u32 %s1371_s6, 4  ;;  %s326_s20 = scalar_lea.vmem [#allocation9], %s1522_s18 }
  0x6e   : > { %1275 = vsyncadd (%p1639_p8), [#allocation7], 4294965248  ;;  %963 = vmatprep.subr.bf16.mxu1 %v1122_v1  ;;  %v1125_v4 = vld [vmem:[#allocation6 + $0x18] sm:$0xff]   ;;  %v329_v5 = vld [vmem:[%s1526_s17] sm:$0xff]  ;;  %s803_s13 = sshll.u32 %s326_s20, 4  ;;  %s1575_s15 = scalar_lea.hbm %s1626_s7, %s918_s25  ;;  %s1577_s13 = int_to_ptr.vmem [resolvable:$true] %s803_s13 }
  0x6f   : > { %964 = vmatpush3.bf16.msra.mxu1 %v1122_v1  ;;  %v330_v6 = vld [vmem:[%s1526_s17 + $0x8] sm:$0xff]  ;;  %v1126_v8 = vld [vmem:[#allocation6 + $0x20] sm:$0xff]   ;;  %v1128_v10 = vld [vmem:[#allocation6 + $0x30] sm:$0xff]   ;;  %s791_s24 = scalar_lea.sflag [#allocation5], %s1522_s18  ;;  %s1224_s6 = scalar_lea.vmem %s1577_s13, 16 }
  0x70   : > { %965 = vmatprep.subr.bf16.mxu1 %v1123_v2  ;;  %v345_v7 = vpack.c.bf16 %v330_v6, %v329_v5  ;;  %v1127_v9 = vld [vmem:[#allocation6 + $0x28] sm:$0xff]   ;;  %v1129_v11 = vld [vmem:[#allocation6 + $0x38] sm:$0xff]   ;;  %v331_v12 = vld [vmem:[%s1526_s17 + $0x10] sm:$0xff]  ;;  %p1225_p11 = scmp.ne.s32.totalorder %s1577_s13, %s1224_s6  ;;  %p1640_p0 = scmp.ne.s32.totalorder %s1635_s14, 0 }
  0x71   : > { %v332_v13 = vld [vmem:[%s1526_s17 + $0x18] sm:$0xff]  ;;  %v333_v14 = vld [vmem:[%s1526_s17 + $0x20] sm:$0xff]  ;;  %v334_v15 = vld [vmem:[%s1526_s17 + $0x28] sm:$0xff] }
  0x72   : > { %979 = vmatprep.mubr.bf16.mxu1 %v345_v7  ;;  %v1130_v16 = vld [vmem:[#allocation8] sm:$0xff]   ;;  %v346_v17 = vpack.c.bf16 %v332_v13, %v331_v12  ;;  %v347_v18 = vpack.c.bf16 %v334_v15, %v333_v14  ;;  %v1131_v19 = vld [vmem:[#allocation8 + $0x8] sm:$0xff]   ;;  %v335_v20 = vld [vmem:[%s1526_s17 + $0x30] sm:$0xff]  ;;  %p1226_p1 = pnand %p1225_p11, %p1640_p0 }
  0x73   : > { %966 = vmatpush3.bf16.msra.mxu1 %v1123_v2  ;;  %v336_v21 = vld [vmem:[%s1526_s17 + $0x38] sm:$0xff]  ;;  %v337_v22 = vld [vmem:[%s1526_s17 + $0x40] sm:$0xff]  ;;  %v338_v23 = vld [vmem:[%s1526_s17 + $0x48] sm:$0xff] }
  0x74   : > { %967 = vmatprep.subr.bf16.mxu1 %v1124_v3  ;;  %v1132_v24 = vld [vmem:[#allocation8 + $0x10] sm:$0xff]   ;;  %v348_v25 = vpack.c.bf16 %v336_v21, %v335_v20  ;;  %v349_v26 = vpack.c.bf16 %v338_v23, %v337_v22  ;;  %v1133_v27 = vld [vmem:[#allocation8 + $0x18] sm:$0xff]   ;;  %v341_v30 = vld [vmem:[%s1526_s17 + $0x60] sm:$0xff]  ;;  %p1227_p3 = pneg %p1226_p1 }
  0x75   : > { %v339_v28 = vld [vmem:[%s1526_s17 + $0x50] sm:$0xff]  ;;  %v340_v29 = vld [vmem:[%s1526_s17 + $0x58] sm:$0xff]  ;;  %v342_v31 = vld [vmem:[%s1526_s17 + $0x68] sm:$0xff] }
  0x76   : > { %v1134_v32 = vld [vmem:[#allocation8 + $0x20] sm:$0xff]   ;;  %v350_v33 = vpack.c.bf16 %v340_v29, %v339_v28  ;;  %v351_v34 = vpack.c.bf16 %v342_v31, %v341_v30  ;;  %v1135_v35 = vld [vmem:[#allocation8 + $0x28] sm:$0xff]   ;;  %v343_v36 = vld [vmem:[%s1526_s17 + $0x70] sm:$0xff] }
  0x77   : > { %968 = vmatpush3.bf16.msra.mxu1 %v1124_v3  ;;  %v344_v37 = vld [vmem:[%s1526_s17 + $0x78] sm:$0xff]  ;;  %v1136_v39 = vld [vmem:[#allocation8 + $0x30] sm:$0xff]   ;;  %s1306_s17 = smov [#allocation9]  }
  0x78   : > { %969 = vmatprep.subr.bf16.mxu1 %v1125_v4  ;;  %v352_v38 = vpack.c.bf16 %v344_v37, %v343_v36  ;;  %v1137_v40 = vld [vmem:[#allocation8 + $0x38] sm:$0xff]   ;;  %v1305_v36 = vmov 0   ;;  %s1228_s8 = sshll.u32 %s1306_s17, 4  ;;  %s1229_s8 = int_to_ptr.vmem [resolvable:$false] %s1228_s8 }
  0x79   : > { %v900_v41 = vld [vmem:[%s1621_s2] ss:$0 sm:$0xff]  ;;  %1121 = vset.pattern.permute.xlu0 %v1305_v36  ;;  %s1230_s10 = scalar_lea.vmem %s1229_s8, 32  ;;  %p1231_p7 = scmp.lt.s32.totalorder %s1577_s13, %s1229_s8 }
  0x7a   : > { %v909_v37 = vld [vmem:[%s1623_s4] ss:$0 sm:$0xff]  ;;  %p1232_p9 = scmp.lt.s32.totalorder %s1230_s10, %s1224_s6 }
  0x7b   : > { %970 = vmatpush3.bf16.msra.mxu1 %v1125_v4 }
  0x7c   : > { %971 = vmatprep.subr.bf16.mxu1 %v1126_v8  ;;  %p1233_p12 = por %p1232_p9, %p1231_p7 }
  0x7e   : > { %p1234_p2 = pnand %p1233_p12, %p1227_p3 }
  0x7f   : > { %972 = vmatpush3.bf16.msra.mxu1 %v1126_v8 }
  0x80   : > { %973 = vmatprep.subr.bf16.mxu1 %v1127_v9 }
  0x83   : > { %974 = vmatpush3.bf16.msra.mxu1 %v1127_v9 }
  0x84   : > { %975 = vmatprep.subr.bf16.mxu1 %v1128_v10 }
  0x87   : > { %976 = vmatpush3.bf16.msra.mxu1 %v1128_v10 }
  0x88   : > { %977 = vmatprep.subr.bf16.mxu1 %v1129_v11 }
  0x8b   : > { %978 = vmatpush3.bf16.msra.mxu1 %v1129_v11 }
  0x8c   : > { %995 = vmatprep.subr.bf16.mxu1 %v1130_v16 }
  0x8e   : > { %980 = vmatmul.mubr.bf16.vlgmr.msra.gmra.mrb[0].mxu1 %v346_v17 }
  0x8f   : > { %983 = vmatprep.mubr.bf16.mxu1 %v347_v18  ;;  %996 = vmatpush3.bf16.msra.mxu1 %v1130_v16 }
  0x90   : > { %997 = vmatprep.subr.bf16.mxu1 %v1131_v19 }
  0x93   : > { %998 = vmatpush3.bf16.msra.mxu1 %v1131_v19 }
  0x94   : > { %999 = vmatprep.subr.bf16.mxu1 %v1132_v24 }
  0x96   : > { %984 = vmatmul.mubr.bf16.gmra.mrb[4].mxu1 %v348_v25 }
  0x97   : > { %987 = vmatprep.mubr.bf16.mxu1 %v349_v26  ;;  %1000 = vmatpush3.bf16.msra.mxu1 %v1132_v24 }
  0x98   : > { %1001 = vmatprep.subr.bf16.mxu1 %v1133_v27 }
  0x9b   : > { %1002 = vmatpush3.bf16.msra.mxu1 %v1133_v27 }
  0x9c   : > { %1003 = vmatprep.subr.bf16.mxu1 %v1134_v32 }
  0x9e   : > { %988 = vmatmul.mubr.bf16.gmra.mrb[8].mxu1 %v350_v33 }
  0x9f   : > { %991 = vmatprep.mubr.bf16.mxu1 %v351_v34  ;;  %1004 = vmatpush3.bf16.msra.mxu1 %v1134_v32  ;;  %v1303_v34 = vmov 0.0  }
  0xa0   : > { %1005 = vmatprep.subr.bf16.mxu1 %v1135_v35  ;;  %1027 = vmatprep.subr.bf16.mxu0 %v1303_v34 }
  0xa1   : > { %1043 = vmatprep.mubr.msk.bf16.mxu0 %vm1304_vm0, %v1303_v34 }
  0xa3   : > { %1006 = vmatpush3.bf16.msra.mxu1 %v1135_v35  ;;  %v738_v35 = vld [vmem:[#allocation2] sm:$0x1] }
  0xa4   : > { %1007 = vmatprep.subr.bf16.mxu1 %v1136_v39  ;;  %741 = vperm.xlu0 %1121, %v738_v35  }
  0xa6   : > { %992 = vmatmul.mubr.bf16.gmra.mrb[12].mxu1 %v352_v38 }
  0xa7   : > { %1008 = vmatpush3.bf16.msra.mxu1 %v1136_v39 }
  0xa8   : > { %1009 = vmatprep.subr.bf16.mxu1 %v1137_v40 }
  0xab   : > { %1010 = vmatpush3.bf16.msra.mxu1 %v1137_v40 }
 0x123   : > { %v742_v35 = vpop.permute.xlu0 %741 }
 0x161   : > { %v981_v42 = vpop.f32.mrb[0].mxu1 }
 0x162   : > { %v467_v43 = vadd.f32 %v981_v42, %v900_v41  ;;  %v458_v44 = vpop.f32.mrb[1].mxu1 }
 0x163   : > { %v459_v45 = vadd.f32 %v900_v41, %v458_v44  ;;  %v982_v46 = vpop.f32.mrb[2].mxu1 }
 0x164   : > { %v470_v47 = vadd.f32 %v982_v46, %v900_v41  ;;  %v461_v48 = vpop.f32.mrb[3].mxu1  ;;  %v523_v50 = vmax.f32 %v467_v43, 0.0 }
 0x165   : > { %v462_v49 = vadd.f32 %v900_v41, %v461_v48  ;;  %v521_v52 = vmax.f32 %v459_v45, 0.0 }
 0x166   : > { %v524_v51 = vmax.f32 %v470_v47, 0.0 }
 0x167   : > { %v522_v53 = vmax.f32 %v462_v49, 0.0 }
 0x168   : > { %v538_v54 = vpack.c.bf16 %v524_v51, %v523_v50 }
 0x169   : > { %v537_v55 = vpack.c.bf16 %v522_v53, %v521_v52  ;;  %v985_v56 = vpop.f32.mrb[4].mxu1 }
 0x16a   : > { %v483_v57 = vadd.f32 %v985_v56, %v900_v41  ;;  %v474_v58 = vpop.f32.mrb[5].mxu1 }
 0x16b   : > { %v475_v59 = vadd.f32 %v900_v41, %v474_v58  ;;  %1011 = vmatprep.mubr.bf16.mxu1 %v537_v55  ;;  %v986_v60 = vpop.f32.mrb[6].mxu1 }
 0x16c   : > { %v527_v61 = vmax.f32 %v483_v57, 0.0  ;;  %v486_v62 = vadd.f32 %v986_v60, %v900_v41  ;;  %1012 = vmatmul.mubr.bf16.vlgmr.msra.gmra.mrb[16].mxu1 %v538_v54  ;;  %v477_v63 = vpop.f32.mrb[7].mxu1 }
 0x16d   : > { %v525_v0 = vmax.f32 %v475_v59, 0.0  ;;  %v478_v1 = vadd.f32 %v900_v41, %v477_v63 }
 0x16e   : > { %v528_v2 = vmax.f32 %v486_v62, 0.0 }
 0x16f   : > { %v526_v3 = vmax.f32 %v478_v1, 0.0 }
 0x170   : > { %v540_v4 = vpack.c.bf16 %v528_v2, %v527_v61 }
 0x171   : > { %v539_v5 = vpack.c.bf16 %v526_v3, %v525_v0  ;;  %v989_v6 = vpop.f32.mrb[8].mxu1 }
 0x172   : > { %v499_v7 = vadd.f32 %v989_v6, %v900_v41  ;;  %v490_v8 = vpop.f32.mrb[9].mxu1 }
 0x173   : > { %1015 = vmatprep.mubr.bf16.mxu1 %v539_v5  ;;  %v491_v9 = vadd.f32 %v900_v41, %v490_v8  ;;  %v990_v10 = vpop.f32.mrb[10].mxu1 }
 0x174   : > { %1016 = vmatmul.mubr.bf16.gmra.mrb[20].mxu1 %v540_v4  ;;  %v531_v11 = vmax.f32 %v499_v7, 0.0  ;;  %v502_v12 = vadd.f32 %v990_v10, %v900_v41  ;;  %v493_v13 = vpop.f32.mrb[11].mxu1 }
 0x175   : > { %v529_v14 = vmax.f32 %v491_v9, 0.0  ;;  %v494_v15 = vadd.f32 %v900_v41, %v493_v13 }
 0x176   : > { %v532_v16 = vmax.f32 %v502_v12, 0.0 }
 0x177   : > { %v530_v17 = vmax.f32 %v494_v15, 0.0 }
 0x178   : > { %v542_v18 = vpack.c.bf16 %v532_v16, %v531_v11 }
 0x179   : > { %v541_v19 = vpack.c.bf16 %v530_v17, %v529_v14  ;;  %v993_v20 = vpop.f32.mrb[12].mxu1 }
 0x17a   : > { %v515_v21 = vadd.f32 %v993_v20, %v900_v41  ;;  %v506_v22 = vpop.f32.mrb[13].mxu1 }
 0x17b   : > { %1019 = vmatprep.mubr.bf16.mxu1 %v541_v19  ;;  %v507_v23 = vadd.f32 %v900_v41, %v506_v22  ;;  %v994_v24 = vpop.f32.mrb[14].mxu1 }
 0x17c   : > { %1020 = vmatmul.mubr.bf16.gmra.mrb[24].mxu1 %v542_v18  ;;  %v535_v25 = vmax.f32 %v515_v21, 0.0  ;;  %v518_v26 = vadd.f32 %v994_v24, %v900_v41  ;;  %v509_v27 = vpop.f32.mrb[15].mxu1 }
 0x17d   : > { %v533_v28 = vmax.f32 %v507_v23, 0.0  ;;  %v510_v29 = vadd.f32 %v900_v41, %v509_v27 }
 0x17e   : > { %v536_v30 = vmax.f32 %v518_v26, 0.0 }
 0x17f   : > { %v534_v31 = vmax.f32 %v510_v29, 0.0 }
 0x180   : > { %v544_v32 = vpack.c.bf16 %v536_v30, %v535_v25  ;;  %v729_v30 = vld [vmem:[%s1624_s5] sm:$0x1] }
 0x181   : > { %v543_v33 = vpack.c.bf16 %v534_v31, %v533_v28  ;;  %v744_v31 = vlaneseq }
 0x183   : > { %1023 = vmatprep.mubr.bf16.mxu1 %v543_v33 }
 0x184   : > { %1024 = vmatmul.mubr.bf16.gmra.mrb[28].mxu1 %v544_v32  ;;  %v745_v32 = vshrl.u32 %v744_v31, 7 }
 0x186   : > { %v746_v33 = vsub.s32 0, %v745_v32 }
 0x188   : > { %v747_v36 = vrot.slane %v742_v35, %v746_v33 }
 0x23f   : > { %v1013_v38 = vpop.f32.mrb[16].mxu1 }
 0x240   : > { %v659_v39 = vadd.f32 %v1013_v38, %v909_v37  ;;  %v650_v40 = vpop.f32.mrb[17].mxu1 }
 0x241   : > { %v651_v41 = vadd.f32 %v909_v37, %v650_v40  ;;  %v1014_v42 = vpop.f32.mrb[18].mxu1 }
 0x242   : > { %v662_v43 = vadd.f32 %v1014_v42, %v909_v37  ;;  %v653_v44 = vpop.f32.mrb[19].mxu1  ;;  %v715_v46 = vmax.f32 %v659_v39, 0.0 }
 0x243   : > { %v654_v45 = vadd.f32 %v909_v37, %v653_v44  ;;  %v713_v48 = vmax.f32 %v651_v41, 0.0 }
 0x244   : > { %v716_v47 = vmax.f32 %v662_v43, 0.0 }
 0x245   : > { %v714_v49 = vmax.f32 %v654_v45, 0.0 }
 0x246   : > { %v731_v50 = vpack.c.bf16 %v716_v47, %v715_v46 }
 0x247   : > { %v1017_v51 = vpop.f32.mrb[20].mxu1  ;;  %v730_v52 = vpack.c.bf16 %v714_v49, %v713_v48 }
 0x248   : > { %v675_v53 = vadd.f32 %v1017_v51, %v909_v37  ;;  %v666_v54 = vpop.f32.mrb[21].mxu1 }
 0x249   : > { %v667_v55 = vadd.f32 %v909_v37, %v666_v54  ;;  %1028 = vmatpush3.bf16.xpose.msra.mxu0 %v730_v52  ;;  %v1018_v56 = vpop.f32.mrb[22].mxu1 }
 0x24a   : > { %v719_v57 = vmax.f32 %v675_v53, 0.0  ;;  %v678_v58 = vadd.f32 %v1018_v56, %v909_v37  ;;  %v669_v59 = vpop.f32.mrb[23].mxu1  ;;  %1029 = vmatprep.subr.bf16.mxu0 %v1303_v34 }
 0x24b   : > { %v717_v60 = vmax.f32 %v667_v55, 0.0  ;;  %v670_v61 = vadd.f32 %v909_v37, %v669_v59 }
 0x24c   : > { %v720_v62 = vmax.f32 %v678_v58, 0.0 }
 0x24d   : > { %v718_v63 = vmax.f32 %v670_v61, 0.0 }
 0x24e   : > { %v733_v0 = vpack.c.bf16 %v720_v62, %v719_v57 }
 0x24f   : > { %v732_v1 = vpack.c.bf16 %v718_v63, %v717_v60  ;;  %v1021_v2 = vpop.f32.mrb[24].mxu1 }
 0x250   : > { %v691_v3 = vadd.f32 %v1021_v2, %v909_v37  ;;  %v682_v4 = vpop.f32.mrb[25].mxu1 }
 0x251   : > { %1030 = vmatpush3.bf16.xpose.msra.mxu0 %v731_v50  ;;  %v683_v5 = vadd.f32 %v909_v37, %v682_v4  ;;  %v1022_v6 = vpop.f32.mrb[26].mxu1 }
 0x252   : > { %v723_v7 = vmax.f32 %v691_v3, 0.0  ;;  %1031 = vmatprep.subr.bf16.mxu0 %v1303_v34  ;;  %v694_v8 = vadd.f32 %v1022_v6, %v909_v37  ;;  %v685_v9 = vpop.f32.mrb[27].mxu1 }
 0x253   : > { %v721_v10 = vmax.f32 %v683_v5, 0.0  ;;  %v686_v11 = vadd.f32 %v909_v37, %v685_v9 }
 0x254   : > { %v724_v12 = vmax.f32 %v694_v8, 0.0 }
 0x255   : > { %v722_v13 = vmax.f32 %v686_v11, 0.0 }
 0x256   : > { %v735_v14 = vpack.c.bf16 %v724_v12, %v723_v7 }
 0x257   : > { %v734_v15 = vpack.c.bf16 %v722_v13, %v721_v10  ;;  %v1025_v16 = vpop.f32.mrb[28].mxu1 }
 0x258   : > { %v707_v17 = vadd.f32 %v1025_v16, %v909_v37  ;;  %v698_v18 = vpop.f32.mrb[29].mxu1 }
 0x259   : > { %1032 = vmatpush3.bf16.xpose.msra.mxu0 %v732_v1  ;;  %v699_v19 = vadd.f32 %v909_v37, %v698_v18  ;;  %v1026_v20 = vpop.f32.mrb[30].mxu1 }
 0x25a   : > { %1033 = vmatprep.subr.bf16.mxu0 %v1303_v34  ;;  %v727_v21 = vmax.f32 %v707_v17, 0.0  ;;  %v710_v22 = vadd.f32 %v1026_v20, %v909_v37  ;;  %v701_v23 = vpop.f32.mrb[31].mxu1 }
 0x25b   : > { %v725_v24 = vmax.f32 %v699_v19, 0.0  ;;  %v702_v25 = vadd.f32 %v909_v37, %v701_v23 }
 0x25c   : > { %v728_v26 = vmax.f32 %v710_v22, 0.0 }
 0x25d   : > { %v726_v27 = vmax.f32 %v702_v25, 0.0 }
 0x25e   : > { %v737_v28 = vpack.c.bf16 %v728_v26, %v727_v21 }
 0x25f   : > { %v736_v29 = vpack.c.bf16 %v726_v27, %v725_v24 }
 0x261   : > { %1034 = vmatpush3.bf16.xpose.msra.mxu0 %v733_v0 }
 0x262   : > { %1035 = vmatprep.subr.bf16.mxu0 %v1303_v34 }
 0x269   : > { %1036 = vmatpush3.bf16.xpose.msra.mxu0 %v734_v15 }
 0x26a   : > { %1037 = vmatprep.subr.bf16.mxu0 %v1303_v34 }
 0x271   : > { %1038 = vmatpush3.bf16.xpose.msra.mxu0 %v735_v14 }
 0x272   : > { %1039 = vmatprep.subr.bf16.mxu0 %v1303_v34 }
 0x279   : > { %1040 = vmatpush3.bf16.xpose.msra.mxu0 %v736_v29 }
 0x27a   : > { %1041 = vmatprep.subr.bf16.mxu0 %v1303_v34 }
 0x281   : > { %1042 = vmatpush3.bf16.xpose.msra.mxu0 %v737_v28 }
 0x288   : > { %1044 = vmatmul.mubr.bf16.vlgmr.msra.gmra.mrb[0].mxu0 %v729_v30 }
 0x35b   : > { %v782_v37 = vpop.f32.mrb[0].mxu0 }
 0x35c   : > { %v783_v38 = vadd.f32 %v782_v37, %v747_v36  ;;  %v1045_v39 = vpop.f32.mrb[1].mxu0 }
 0x35d   : > { %v785_v34 = vpop.f32.mrb[2].mxu0 }
 0x35e   : > { %v788_v40 = vand.u32 2147483647, %v783_v38  ;;  %v1046_v41 = vpop.f32.mrb[3].mxu0 }
 0x360   : > { %789 = vst [vmem:[%s326_s20] sm:$0x1] %v788_v40 }
 0x361   : > { %1237 = shalt.err (!%p1234_p2)
}
 0x362   : > { %s1238_s18 = scalar_lea.hbm %s1575_s15, 16  ;;  %s1242_s12 = scalar_lea.hbm %s1626_s7, 32 }
 0x363   : > { %p1239_p13 = scmp.ne.s32.totalorder %s1575_s15, %s1238_s18  ;;  %p1243_p4 = scmp.lt.u32.totalorder %s1575_s15, %s1626_s7 }
 0x364   : > { %p1244_p5 = scmp.lt.u32.totalorder %s1242_s12, %s1238_s18  ;;  %p1246_p11 = scmp.lt.u32.totalorder %s1238_s18, %s1575_s15 }
 0x365   : > { %p1240_p6 = pnand %p1239_p13, %p1640_p0 }
 0x366   : > { %p1245_p8 = por %p1244_p5, %p1243_p4 }
 0x367   : > { %p1241_p10 = pneg %p1240_p6 }
 0x368   : > { %p1247_p1 = por %p1246_p11, %p1245_p8 }
 0x36a   : > { %p1248_p3 = pnand %p1247_p1, %p1241_p10 }
 0x36c   : > { %1251 = shalt.err (!%p1248_p3)
}
 0x36d   : > { %1057 = dma.vmem_to_hbm [thread:$0]  (%p1640_p0), %s1577_s13, 16, %s1575_s15, %s791_s24  }
 0x36e PF: > { %s815_s20 = sand.u32 1, %s1282_s26   ;;  %p1641_p7 = scmp.ne.s32.totalorder %s1631_s9, 0 }
 0x36f   : > { %p1642_p9 = scmp.ge.s32.totalorder %s1294_s29, 2  ;;  %s816_s23 = scalar_lea.sflag [#allocation5], %s815_s20 }
 0x371   : > { %p1071_p12 = pnand %p1642_p9, %p1641_p7 }
 0x373   : > { %1277 = dma.done.wait (!%p1071_p12), %s816_s23, 16  }
 0x374   : > { %1279 = vsyncadd (!%p1071_p12), %s816_s23, 4294967280  ;;  %p23_p2 = scmp.ge.s32.totalorder %s1460_s30, 4   ;;  %s1643_s26 = smov %s1286_s27 }
 0x375   : > { %s1644_s27 = smov %s1290_s28  ;;  %s1645_s28 = smov %s1476_s16 }
 0x376   : > { %s1646_s29 = smov %s1460_s30  ;;  %25 = sbr.rel (!%p23_p2) target bundleno = 9 (0x9), region = 101 }
 0x37d   :  { %820 = vsyncpa [#allocation4], 1 }
 0x37e   :  { %822 = vsyncpa [#allocation4 + $0x1], 1 }
 0x37f   :  { %823 = vsyncpa [#allocation7], 1 }
 0x380   :  { %824 = vsyncpa [#allocation5], 1 }
 0x381   :  { %826 = vsyncpa [#allocation5 + $0x1], 1 }

</bundles_post_ra>
